<compile_context>
chip_gen: v7x
topology: tpu7x:2x2x1
jax: 0.10.0
libtpu: 0.0.40
codegen_flags: <defaults>
</compile_context>

<pallas_src>
import jax
import jax.numpy as jnp
from jax.experimental import pallas as pl
from jax.experimental.pallas import tpu as pltpu

_LANE = 128


def _relation_kernel(qt_ref, w1qt_ref, beff_ref, w2t_ref, b2_ref, o_ref):
    # qt_ref:   (d, tn)  bf16   -- streamed query tile (feature-major)
    # w1qt_ref: (h, d)   bf16   -- m-scaled W1 query block, resident
    # beff_ref: (h, 1)   f32    -- S.sum(0) @ W1_s + b1, resident
    # w2t_ref:  (C, h)   f32    -- resident
    # b2_ref:   (C, 1)   f32    -- resident
    # o_ref:    (C, tn)  f32    -- softmax probabilities, transposed
    z1 = jnp.dot(w1qt_ref[...], qt_ref[...],
                 preferred_element_type=jnp.float32) + beff_ref[...]   # (h, tn)
    z2 = jnp.maximum(z1, 0.0)                                          # relu
    # TODO(synk): training-mode F.dropout(p=0.5) is stochastic; eval-mode
    # (identity) semantics are implemented here.
    logits = jnp.dot(w2t_ref[...], z2,
                     preferred_element_type=jnp.float32) + b2_ref[...]  # (C, tn)

    # softmax over the class axis (axis 0 in the transposed layout)
    mx = jnp.max(logits, axis=0, keepdims=True)                        # (1, tn)
    e = jnp.exp(logits - mx)
    denom = jnp.sum(e, axis=0, keepdims=True)                          # (1, tn)
    o_ref[...] = (e * pl.reciprocal(denom, approx=True)).astype(o_ref.dtype)


def _round_up(x, mult):
    return ((x + mult - 1) // mult) * mult


def relation_work_forward(S, Q, lin1_w, lin1_b, lin2_w, lin2_b, tn=16384):
    """S: (m, d), Q: (n, d). lin1_w: (hidden, 2d), lin2_w: (C, hidden)."""
    S = S.astype(jnp.float32)
    Q = Q.astype(jnp.float32)
    m, d = S.shape
    n = Q.shape[0]
    hidden = lin1_w.shape[0]
    num_class = lin2_w.shape[0]

    # ---- glue (tiny, query-independent) ------------------------------------
    w1 = lin1_w.astype(jnp.float32)                      # (hidden, 2d), torch (out,in)
    w1_s = w1[:, :d]                                     # (hidden, d)
    # Fold the scalar m into the weight; cast the streamed weight to bf16.
    w1_qT = (w1[:, d:] * jnp.float32(m)).astype(jnp.bfloat16)   # (hidden, d)
    # Effective bias: S.sum(0) @ W1_s + b1 -- identical for every query row.
    b_eff = (w1_s @ jnp.sum(S, axis=0)
             + lin1_b.astype(jnp.float32)).reshape(hidden, 1)   # (hidden, 1)
    w2T = lin2_w.astype(jnp.float32)                     # (C, hidden) -- resident, keep f32
    b2 = lin2_b.astype(jnp.float32).reshape(num_class, 1)

    # ---- query-axis tiling (lane axis of every block) -----------------------
    n_min = _round_up(n, _LANE)
    tn_req = _round_up(max(int(tn), _LANE), _LANE)
    # Clamp the tile by a VMEM budget derived from actual per-column bytes:
    # Q (bf16, 2 bufs) + out (f32, 2 bufs) + z1/z2/logits/exp intermediates.
    bytes_per_col = (2 * d * 2) + (2 * num_class * 4) + (2 * hidden + 4 * num_class) * 4
    max_tn = max(_LANE, ((32 * 1024 * 1024) // bytes_per_col) // _LANE * _LANE)
    tn_eff = min(tn_req, n_min, max_tn)
    # v7x has 2 TensorCores: make sure the "parallel" axis has >= 2 steps
    # whenever there is enough work to split.
    if n_min // tn_eff < 2 and n_min >= 2 * _LANE:
        tn_eff = _round_up((n_min + 1) // 2, _LANE)
    n_pad = _round_up(n, tn_eff)
    grid = (n_pad // tn_eff,)

    # Transposed, bf16, padded query stream (pad/cast/transpose fuse in XLA).
    Qp = Q
    if n_pad != n:
        Qp = jnp.pad(Qp, ((0, n_pad - n), (0, 0)))
    Qt = Qp.T.astype(jnp.bfloat16)                       # (d, n_pad)

    # VMEM limit derived from the chosen tile (stay well under v7x's 64 MiB).
    weight_bytes = hidden * d * 2 + hidden * 4 + num_class * hidden * 4 + num_class * 4
    step_bytes = (2 * d * tn_eff * 2                     # Qt double-buffered
                  + 2 * num_class * tn_eff * 4           # out double-buffered
                  + 2 * weight_bytes                     # resident operands
                  + (2 * hidden + 4 * num_class) * tn_eff * 4)   # intermediates
    vmem_limit = int(min(48 * 1024 * 1024, max(16 * 1024 * 1024, 2 * step_bytes)))

    cost = pl.CostEstimate(
        flops=2 * n_pad * (d * hidden + hidden * num_class),
        transcendentals=n_pad * (num_class + 1),
        bytes_accessed=n_pad * d * 2 + n_pad * num_class * 4 + weight_bytes,
    )

    out_t = pl.pallas_call(
        _relation_kernel,
        out_shape=jax.ShapeDtypeStruct((num_class, n_pad), jnp.float32),
        grid=grid,
        in_specs=[
            pl.BlockSpec((d, tn_eff), lambda i: (0, i)),            # Qt (streamed)
            pl.BlockSpec((hidden, d), lambda i: (0, 0)),            # w1_qT (resident)
            pl.BlockSpec((hidden, 1), lambda i: (0, 0)),            # b_eff (resident)
            pl.BlockSpec((num_class, hidden), lambda i: (0, 0)),    # w2T (resident)
            pl.BlockSpec((num_class, 1), lambda i: (0, 0)),         # b2 (resident)
        ],
        out_specs=pl.BlockSpec((num_class, tn_eff), lambda i: (0, i)),
        compiler_params=pltpu.CompilerParams(
            dimension_semantics=("parallel",),
            vmem_limit_bytes=vmem_limit,
        ),
        cost_estimate=cost,
    )(Qt, w1_qT, b_eff, w2T, b2)

    # Tiny glue transpose back to the module's (n, C) layout.
    return out_t[:, :n].T


def _reference(S, Q, lin1_w, lin1_b, lin2_w, lin2_b):
    """Module math in f32, with the kernel's bf16 rounding applied to the
    streamed operands (Q and the m-scaled W1 query block).  This isolates
    kernel plumbing (tiling / transposes / padding / bias folding / softmax)
    from the chosen streaming precision."""
    m, d = S.shape
    w1 = lin1_w.astype(jnp.float32)
    w1_s, w1_q = w1[:, :d], w1[:, d:]
    w1_q_r = (w1_q * jnp.float32(m)).astype(jnp.bfloat16).astype(jnp.float32)
    q_r = Q.astype(jnp.float32).astype(jnp.bfloat16).astype(jnp.float32)
    b_eff = w1_s @ jnp.sum(S.astype(jnp.float32), axis=0) + lin1_b
    z1 = q_r @ w1_q_r.T + b_eff
    z2 = jnp.maximum(z1, 0.0)
    logits = z2 @ lin2_w.T + lin2_b
    return jax.nn.softmax(logits, axis=1)


if __name__ == "__main__":
    # Few-shot relation net shapes (comment in Z(): "100 x 16 query, 5 x 16
    # prototype"); n chosen so the grid has 2 steps and n is not a multiple of
    # 128 (exercises padding + the pipelined / parallel query axis).
    input_dim, hidden_dim, num_class = 16, 32, 8
    m, n = 5, 400                                   # prototypes, queries

    key = jax.random.PRNGKey(0)
    ks = jax.random.split(key, 6)

    def xavier(k, shape):
        fan_out, fan_in = shape
        a = 1.414 * (6.0 / (fan_in + fan_out)) ** 0.5
        return jax.random.uniform(k, shape, jnp.float32, -a, a)

    lin1_w = xavier(ks[0], (hidden_dim, input_dim * 2))
    lin1_b = jax.random.uniform(ks[1], (hidden_dim,), jnp.float32)
    lin2_w = xavier(ks[2], (num_class, hidden_dim))
    lin2_b = jax.random.uniform(ks[3], (num_class,), jnp.float32)

    S = jax.random.normal(ks[4], (m, input_dim), jnp.float32)
    Q = jax.random.normal(ks[5], (n, input_dim), jnp.float32)

    fwd = jax.jit(relation_work_forward, static_argnames=("tn",))
    out = jax.block_until_ready(fwd(S, Q, lin1_w, lin1_b, lin2_w, lin2_b, tn=256))

    assert out.shape == (n, num_class)
    assert bool(jnp.all(jnp.isfinite(out)))
    # Softmax rows sum to 1 (approx reciprocal -> ~1e-3 slack).
    assert bool(jnp.all(jnp.abs(jnp.sum(out, axis=1) - 1.0) < 5e-3))
    # Tight check vs. the bf16-matched reference (approx reciprocal + f32
    # accumulation-order differences only).
    ref = _reference(S, Q, lin1_w, lin1_b, lin2_w, lin2_b)
    assert jnp.allclose(out, ref, atol=3e-3, rtol=3e-3), "mismatch vs reference"

    print("KERNEL_OK")
</pallas_src>

<mosaic_0001>
module attributes {stable_mosaic.version = 11 : i64} {
  func.func @_relation_kernel(%arg0: i32, %arg1: memref<16x256xbf16, #tpu.memory_space<vmem>>, %arg2: memref<32x16xbf16, #tpu.memory_space<vmem>>, %arg3: memref<32x1xf32, #tpu.memory_space<vmem>>, %arg4: memref<8x32xf32, #tpu.memory_space<vmem>>, %arg5: memref<8x1xf32, #tpu.memory_space<vmem>>, %arg6: memref<8x256xf32, #tpu.memory_space<vmem>>) attributes {dimension_semantics = [#tpu.dimension_semantics<parallel>], iteration_bounds = array<i64: 2>, scalar_prefetch = 0 : i64, scratch_operands = 0 : i64, tpu.core_type = #tpu.core_type<tc>, window_params = [{transform_indices = @transform_0, window_bounds = array<i64: 16, 256>}, {pipeline_mode = #tpu.pipeline_mode<synchronous>, transform_indices = @transform_1, window_bounds = array<i64: 32, 16>}, {pipeline_mode = #tpu.pipeline_mode<synchronous>, transform_indices = @transform_2, window_bounds = array<i64: 32, 1>}, {pipeline_mode = #tpu.pipeline_mode<synchronous>, transform_indices = @transform_3, window_bounds = array<i64: 8, 32>}, {pipeline_mode = #tpu.pipeline_mode<synchronous>, transform_indices = @transform_4, window_bounds = array<i64: 8, 1>}, {transform_indices = @transform_5, window_bounds = array<i64: 8, 256>}]} {
    %c0 = arith.constant 0 : index
    %c0_0 = arith.constant 0 : index
    %0 = vector.load %arg2[%c0, %c0_0] : memref<32x16xbf16, #tpu.memory_space<vmem>>, vector<32x16xbf16>
    %c0_1 = arith.constant 0 : index
    %c0_2 = arith.constant 0 : index
    %1 = vector.load %arg1[%c0_1, %c0_2] : memref<16x256xbf16, #tpu.memory_space<vmem>>, vector<16x256xbf16>
    %cst = arith.constant dense<0.000000e+00> : vector<32x256xf32>
    %2 = tpu.matmul %0, %1, %cst {dimension_numbers = #tpu.dot_dimension_numbers<[1], [0], [0], [1], [0, 0, 1, 1], [], []>} : vector<32x16xbf16>, vector<16x256xbf16>, vector<32x256xf32> -> vector<32x256xf32>
    %c0_3 = arith.constant 0 : index
    %c0_4 = arith.constant 0 : index
    %3 = vector.load %arg3[%c0_3, %c0_4] : memref<32x1xf32, #tpu.memory_space<vmem>>, vector<32x1xf32>
    %4 = vector.broadcast %3 : vector<32x1xf32> to vector<32x256xf32>
    %5 = arith.addf %2, %4 : vector<32x256xf32>
    %cst_5 = arith.constant 0.000000e+00 : f32
    %6 = vector.broadcast %cst_5 : f32 to vector<32x256xf32>
    %7 = arith.maximumf %5, %6 : vector<32x256xf32>
    %c0_6 = arith.constant 0 : index
    %c0_7 = arith.constant 0 : index
    %8 = vector.load %arg4[%c0_6, %c0_7] : memref<8x32xf32, #tpu.memory_space<vmem>>, vector<8x32xf32>
    %cst_8 = arith.constant dense<0.000000e+00> : vector<8x256xf32>
    %9 = tpu.matmul %8, %7, %cst_8 {dimension_numbers = #tpu.dot_dimension_numbers<[1], [0], [0], [1], [0, 0, 1, 1], [], []>} : vector<8x32xf32>, vector<32x256xf32>, vector<8x256xf32> -> vector<8x256xf32>
    %c0_9 = arith.constant 0 : index
    %c0_10 = arith.constant 0 : index
    %10 = vector.load %arg5[%c0_9, %c0_10] : memref<8x1xf32, #tpu.memory_space<vmem>>, vector<8x1xf32>
    %11 = vector.broadcast %10 : vector<8x1xf32> to vector<8x256xf32>
    %12 = arith.addf %9, %11 : vector<8x256xf32>
    %cst_11 = arith.constant dense<0xFF800000> : vector<256xf32>
    %13 = vector.multi_reduction <maximumf>, %12, %cst_11 [0] : vector<8x256xf32> to vector<256xf32>
    %14 = vector.shape_cast %13 : vector<256xf32> to vector<1x256xf32>
    %15 = vector.broadcast %14 : vector<1x256xf32> to vector<8x256xf32>
    %16 = arith.subf %12, %15 : vector<8x256xf32>
    %17 = math.exp %16 : vector<8x256xf32>
    %cst_12 = arith.constant dense<0.000000e+00> : vector<256xf32>
    %18 = vector.multi_reduction <add>, %17, %cst_12 [0] : vector<8x256xf32> to vector<256xf32>
    %19 = vector.shape_cast %18 : vector<256xf32> to vector<1x256xf32>
    %20 = tpu.reciprocal %19 {approx = true} : vector<1x256xf32> -> vector<1x256xf32>
    %21 = vector.broadcast %20 : vector<1x256xf32> to vector<8x256xf32>
    %22 = arith.mulf %17, %21 : vector<8x256xf32>
    %c0_13 = arith.constant 0 : index
    %c0_14 = arith.constant 0 : index
    %23 = vector.load %arg6[%c0_13, %c0_14] : memref<8x256xf32, #tpu.memory_space<vmem>>, vector<8x256xf32>
    tpu.vector_store %arg6[%c0_13, %c0_14], %22 {strides = array<i32>} : memref<8x256xf32, #tpu.memory_space<vmem>>, vector<8x256xf32>,
    return
  }
  func.func @transform_0(%arg0: i32) -> (i32, i32) {
    %c0_i32 = arith.constant 0 : i32
    %c0_i32_0 = arith.constant 0 : i32
    return %c0_i32, %arg0 : i32, i32
  }
  func.func @transform_1(%arg0: i32) -> (i32, i32) {
    %c0_i32 = arith.constant 0 : i32
    %c0_i32_0 = arith.constant 0 : i32
    %c0_i32_1 = arith.constant 0 : i32
    return %c0_i32, %c0_i32_0 : i32, i32
  }
  func.func @transform_2(%arg0: i32) -> (i32, i32) {
    %c0_i32 = arith.constant 0 : i32
    %c0_i32_0 = arith.constant 0 : i32
    %c0_i32_1 = arith.constant 0 : i32
    return %c0_i32, %c0_i32_0 : i32, i32
  }
  func.func @transform_3(%arg0: i32) -> (i32, i32) {
    %c0_i32 = arith.constant 0 : i32
    %c0_i32_0 = arith.constant 0 : i32
    %c0_i32_1 = arith.constant 0 : i32
    return %c0_i32, %c0_i32_0 : i32, i32
  }
  func.func @transform_4(%arg0: i32) -> (i32, i32) {
    %c0_i32 = arith.constant 0 : i32
    %c0_i32_0 = arith.constant 0 : i32
    %c0_i32_1 = arith.constant 0 : i32
    return %c0_i32, %c0_i32_0 : i32, i32
  }
  func.func @transform_5(%arg0: i32) -> (i32, i32) {
    %c0_i32 = arith.constant 0 : i32
    %c0_i32_0 = arith.constant 0 : i32
    return %c0_i32, %arg0 : i32, i32
  }
}

</mosaic_0001>

<bundles_post_ra>
// kernel: relation_work_forward.1
= control target key start
LH: loop header
LB: loop body
LE: loop exit
PB: predicated region body
PF: predicated region fallthrough
CT: control target
= control target key end

     0   :  { %s693_s18 = smov 0   ;;  %s695_s19 = smov 0   ;;  %s769_s0 = inlined_call_operand.vmem [shape: bf16[16,512], index: 0, kind: input, shape index: {}]   ;;  %s770_s1 = inlined_call_operand.vmem [shape: bf16[32,16], index: 1, kind: input, shape index: {}]   ;;  %s771_s2 = inlined_call_operand.vmem [shape: f32[32,1], index: 2, kind: input, shape index: {}]   ;;  %s772_s3 = inlined_call_operand.vmem [shape: f32[8,32], index: 3, kind: input, shape index: {}]   ;;  %s773_s4 = inlined_call_operand.vmem [shape: f32[8,1], index: 4, kind: input, shape index: {}]   ;;  %s774_s5 = inlined_call_operand.vmem [shape: f32[8,512], index: 5, kind: output, shape index: {}]  }
   0x1   :  { %s697_s20 = smov 0  }
   0x2 LB: > { %s565_s21 = sadd.s32 4294967295, %s659_s20   ;;  %s710_s22 = sadd.s32 1, %s659_s20   ;;  %s659_s20 = sphi %s697_s20, %s777_s20   ;;  %s655_s19 = sphi %s695_s19, %s776_s19   ;;  %s651_s18 = sphi %s693_s18, %s775_s18  }
   0x3   : > { %s19_s23 = ssub.s32 %s659_s20, %s710_s22  ;;  %s22_s24 = sadd.s32 1, %s655_s19 }
   0x4   : > { %p20_p0 = scmp.eq.s32.totalorder %s19_s23, 0  ;;  %p29_p1 = scmp.ne.s32.totalorder %s655_s19, %s651_s18 }
   0x5   : > { %p30_p2 = scmp.eq.s32.totalorder %s659_s20, 0  ;;  %p568_p4 = scmp.ge.s32.totalorder %s659_s20, 2 }
   0x6   : > { %s719_s25 = scalar_select %p20_p0, %s655_s19, %s22_s24  }
   0x7   : > { %p31_p3 = por %p30_p2, %p29_p1  ;;  %177 = sbr.rel (%p568_p4) target bundleno = 21 (0x15), region = 32 }
   0xe   : > { %180 = sbr.rel (!%p31_p3) target bundleno = 21 (0x15), region = 36  ;;  %s182_s26 = sand.u32 (%p31_p3), 1, %s655_s19  }
   0xf   : > { %s585_s27 = sshll.u32 (%p31_p3), %s659_s20, 3  ;;  %s569_s28 = sshll.u32 (%p31_p3), %s182_s26, 4 }
  0x10   : > { %s187_s6 = scalar_lea.vmem (%p31_p3), %s769_s0, %s585_s27  ;;  %s184_s7 = scalar_lea.vmem (%p31_p3), [#allocation2], %s569_s28 }
  0x11   : > { %v217_v0 = vld [vmem:[%s187_s6] sm:$0xff] (%p31_p3)  ;;  %v219_v1 = vld [vmem:[%s187_s6 + $0x10] sm:$0xff] (%p31_p3) }
  0x12   : > { %218 = vst [vmem:[%s184_s7] sm:$0xff] (%p31_p3), %v217_v0  ;;  %220 = vst [vmem:[%s184_s7 + $0x8] sm:$0xff] (%p31_p3), %v219_v1 }
  0x15 PF: > { %p572_p5 = scmp.ge.s32.totalorder %s659_s20, 1  ;;  %p225_p6 = scmp.lt.s32.totalorder %s659_s20, 3 }
  0x17   : > { %p226_p7 = pnand %p572_p5, %p225_p6 }
  0x18   : > { %s232_s8 = sand.u32 (!%p226_p7), 1, %s651_s18   ;;  %v661_v2 = vmov (!%p226_p7), 0   ;;  %v273_v3 = vld [vmem:[%s771_s2] sm:$0xff] (!%p226_p7)  ;;  %v274_v6 = vld [vmem:[%s771_s2 + $0x8] sm:$0xff] (!%p226_p7)  ;;  %v275_v7 = vld [vmem:[%s771_s2 + $0x10] sm:$0xff] (!%p226_p7)  ;;  %vm317_vm0 = vcmask (!%p226_p7), 130048  }
  0x19   : > { %229 = sbr.rel (%p226_p7) target bundleno = 529 (0x211), region = 74  ;;  %s573_s9 = sshll.u32 (!%p226_p7), %s232_s8, 4  ;;  %356 = vmatprep.mubr.bf16.mxu0 (!%p226_p7), %v661_v2  ;;  %366 = vmatprep.mubr.bf16.mxu1 (!%p226_p7), %v661_v2  ;;  %v627_v8 = vld [vmem:[%s770_s1] sm:$0xff] (!%p226_p7)   ;;  %v628_v9 = vld [vmem:[%s770_s1 + $0x8] sm:$0xff] (!%p226_p7)   ;;  %v276_v11 = vld [vmem:[%s771_s2 + $0x18] sm:$0xff] (!%p226_p7)  ;;  %v662_v12 = vmov (!%p226_p7), 0.0  }
  0x1a   : > { %622 = vset.pattern.permute.xlu0 (!%p226_p7), %v661_v2  ;;  %623 = vset.pattern.permute.xlu1 (!%p226_p7), %v661_v2  ;;  %s234_s12 = scalar_lea.vmem (!%p226_p7), [#allocation2], %s573_s9  ;;  %v386_v10 = vld [vmem:[%s773_s4] sm:$0xff] (!%p226_p7)  ;;  %vm392_vm1 = vcmask (!%p226_p7), 261120   ;;  %s574_s7 = sshll.u32 (!%p226_p7), %s565_s21, 1 }
  0x1b   : > { %v624_v4 = vld [vmem:[%s234_s12 + $0x4] ss:$8 sps:$4 sm:$0xff] (!%p226_p7)   ;;  %279 = vperm.xlu0 (!%p226_p7), %622, %v273_v3   ;;  %v626_v5 = vld [vmem:[%s234_s12] ss:$8 sps:$4 sm:$0xff] (!%p226_p7)   ;;  %289 = vperm.xlu1 (!%p226_p7), %623, %v275_v7   ;;  %p261_p8 = scmp.lt.s32.totalorder (!%p226_p7), %s574_s7, 3 }
  0x1c   : > { %324 = vmatprep.subr.bf16.mxu0 (!%p226_p7), %v624_v4  ;;  %594 = vmatprep.subr.bf16.mxu1 (!%p226_p7), %v624_v4  ;;  %v385_v45 = vld [vmem:[%s772_s3] sm:$0xff] (!%p226_p7) }
  0x1d   : > { %325 = vmatpush1.bf16.msra.mxu0 (!%p226_p7), %v626_v5  ;;  %595 = vmatpush1.bf16.msra.mxu1 (!%p226_p7), %v626_v5 }
  0x1f   : > { %284 = vperm.xlu0 (!%p226_p7), %622, %v274_v6   ;;  %294 = vperm.xlu1 (!%p226_p7), %623, %v276_v11  }
  0x20   : > { %580 = vmatmul.mubr.msk.bf16.vlgmr.msra.gmra.mrb[0].mxu0 %vm317_vm0, %v627_v8  ;;  %581 = vmatmul.mubr.msk.bf16.vlgmr.msra.gmra.mrb[0].mxu1 %vm317_vm0, %v628_v9  ;;  %s779_s7 = smov (!%p261_p8, %s574_s7), 3 }
  0x21   : > { %460 = vmatprep.mubr.f32.mxu1 %v662_v12  ;;  %s575_s8 = sshll.u32 %s779_s7, 3 }
  0x22   : > { %s264_s11 = scalar_lea.vmem %s774_s5, %s575_s8 }
  0x23   : > { %389 = vperm.xlu0 %622, %v386_v10  }
  0x9a   : > { %v280_v13 = vpop.permute.xlu0 %279  ;;  %v290_v14 = vpop.permute.xlu1 %289 }
  0x9e   : > { %v285_v15 = vpop.permute.xlu0 %284  ;;  %v295_v16 = vpop.permute.xlu1 %294 }
  0xa2   : > { %v390_v46 = vpop.permute.xlu0 %389 }
  0xf3   : > { %v358_v17 = vpop.f32.mrb[0].mxu0  ;;  %v368_v18 = vpop.f32.mrb[0].mxu1 }
  0xf4   : > { %v359_v19 = vadd.f32 %v358_v17, %v280_v13  ;;  %v369_v20 = vadd.f32 %v368_v18, %v290_v14  ;;  %v360_v21 = vpop.f32.mrb[1].mxu0  ;;  %v370_v22 = vpop.f32.mrb[1].mxu1 }
  0xf5   : > { %v361_v23 = vadd.f32 %v360_v21, %v280_v13  ;;  %v371_v24 = vadd.f32 %v370_v22, %v290_v14  ;;  %v362_v25 = vpop.f32.mrb[2].mxu0  ;;  %v372_v26 = vpop.f32.mrb[2].mxu1 }
  0xf6   : > { %v381_v27 = vmax.f32 %v369_v20, 0.0  ;;  %v363_v28 = vadd.f32 %v362_v25, %v285_v15  ;;  %v373_v29 = vadd.f32 %v372_v26, %v295_v16  ;;  %v364_v30 = vpop.f32.mrb[3].mxu0  ;;  %v374_v31 = vpop.f32.mrb[3].mxu1  ;;  %v377_v35 = vmax.f32 %v359_v19, 0.0 }
  0xf7   : > { %v382_v32 = vmax.f32 %v371_v24, 0.0  ;;  %v365_v33 = vadd.f32 %v364_v30, %v285_v15  ;;  %v375_v34 = vadd.f32 %v374_v31, %v295_v16  ;;  %v378_v38 = vmax.f32 %v361_v23, 0.0 }
  0xf8   : > { %v379_v36 = vmax.f32 %v363_v28, 0.0  ;;  %v383_v37 = vmax.f32 %v373_v29, 0.0 }
  0xf9   : > { %v380_v39 = vmax.f32 %v365_v33, 0.0  ;;  %v384_v40 = vmax.f32 %v375_v34, 0.0 }
  0xfa   : > { %v588_v41 = vpack.c.bf16 %v379_v36, %v377_v35  ;;  %v592_v42 = vpack.c.bf16 %v383_v37, %v381_v27 }
  0xfb   : > { %v586_v43 = vpack.c.bf16 %v380_v39, %v378_v38  ;;  %v590_v44 = vpack.c.bf16 %v384_v40, %v382_v32 }
  0xfd   : > { %587 = vmatprep.subr.bf16.mxu1 %v586_v43 }
  0xfe   : > { %589 = vmatpush1.bf16.msra.mxu1 %v588_v41 }
  0xff   : > { %591 = vmatprep.subr.bf16.mxu1 %v590_v44 }
 0x102   : > { %593 = vmatpush1.bf16.msra.mxu1 %v592_v42 }
 0x105   : > { %582 = vmatmul.mubr.msk.f32.vlgmr.msra.gmra.mrb[4].mxu1 %vm392_vm1, %v385_v45 }
 0x1d8   : > { %v462_v47 = vpop.f32.mrb[4].mxu1 }
 0x1d9   : > { %v463_v48 = vadd.f32 %v462_v47, %v390_v46  ;;  %v464_v49 = vpop.f32.mrb[5].mxu1 }
 0x1da   : > { %v465_v50 = vadd.f32 %v464_v49, %v390_v46 }
 0x1db   : > { %v467_v51 = vrot.slane %v463_v48, 4 }
 0x1dc   : > { %v473_v52 = vrot.slane %v465_v50, 4 }
 0x1dd   : > { %v468_v53 = vmax.f32 %v463_v48, %v467_v51 }
 0x1de   : > { %v474_v54 = vmax.f32 %v465_v50, %v473_v52 }
 0x1df   : > { %v469_v55 = vrot.slane %v468_v53, 2 }
 0x1e0   : > { %v475_v56 = vrot.slane %v474_v54, 2 }
 0x1e1   : > { %v470_v57 = vmax.f32 %v468_v53, %v469_v55 }
 0x1e2   : > { %v476_v58 = vmax.f32 %v474_v54, %v475_v56 }
 0x1e3   : > { %v471_v59 = vrot.slane %v470_v57, 1 }
 0x1e4   : > { %v477_v60 = vrot.slane %v476_v58, 1 }
 0x1e5   : > { %v472_v61 = vmax.f32 %v470_v57, %v471_v59 }
 0x1e6   : > { %v478_v62 = vmax.f32 %v476_v58, %v477_v60 }
 0x1e7   : > { %v479_v63 = vsub.f32 %v463_v48, %v472_v61 }
 0x1e8   : > { %v480_v0 = vsub.f32 %v465_v50, %v478_v62 }
 0x1e9   : > { %v481_v1 = vmul.f32 1.442695, %v479_v63 }
 0x1ea   : > { %v483_v2 = vmul.f32 1.442695, %v480_v0 }
 0x1eb   : > { %629 = vpow2.f32 %v481_v1 }
 0x1ec   : > { %631 = vpow2.f32 %v483_v2 }
 0x1f5   : > { %v630_v3 = vpop.eup %629 }
 0x1f6   : > { %v632_v4 = vpop.eup %631  ;;  %v485_v5 = vrot.slane %v630_v3, 4 }
 0x1f7   : > { %v491_v6 = vrot.slane %v632_v4, 4 }
 0x1f8   : > { %v486_v7 = vadd.f32 %v630_v3, %v485_v5 }
 0x1f9   : > { %v492_v8 = vadd.f32 %v632_v4, %v491_v6 }
 0x1fa   : > { %v487_v9 = vrot.slane %v486_v7, 2 }
 0x1fb   : > { %v493_v10 = vrot.slane %v492_v8, 2 }
 0x1fc   : > { %v488_v11 = vadd.f32 %v487_v9, %v486_v7 }
 0x1fd   : > { %v494_v12 = vadd.f32 %v493_v10, %v492_v8 }
 0x1fe   : > { %v489_v13 = vrot.slane %v488_v11, 1 }
 0x1ff   : > { %v495_v14 = vrot.slane %v494_v12, 1 }
 0x200   : > { %v490_v15 = vadd.f32 %v489_v13, %v488_v11 }
 0x201   : > { %v496_v16 = vadd.f32 %v495_v14, %v494_v12 }
 0x202   : > { %633 = vrcp.f32 %v490_v15 }
 0x203   : > { %635 = vrcp.f32 %v496_v16 }
 0x20c   : > { %v634_v17 = vpop.eup %633 }
 0x20d   : > { %v636_v18 = vpop.eup %635  ;;  %v499_v19 = vmul.f32 %v634_v17, %v630_v3 }
 0x20e   : > { %v500_v20 = vmul.f32 %v636_v18, %v632_v4 }
 0x20f   : > { %501 = vst [vmem:[%s264_s11] sm:$0xff] %v499_v19 }
 0x210   : > { %502 = vst [vmem:[%s264_s11 + $0x8] sm:$0xff] %v500_v20 }
 0x211 PF: > { %p12_p9 = scmp.ge.s32.totalorder %s710_s22, 4   ;;  %s775_s18 = smov %s655_s19 }
 0x212   : > { %s776_s19 = smov %s719_s25  ;;  %s777_s20 = smov %s710_s22 }
 0x213   :  { %14 = sbr.rel (!%p12_p9) target bundleno = 2 (0x2), region = 113 }

</bundles_post_ra>
